<compile_context>
chip_gen: v5e
topology: v5e:2x2
jax: 0.10.0
libtpu: 0.0.40
codegen_flags: <defaults>
</compile_context>

<pallas_src>
import jax
import jax.numpy as jnp
import numpy as np
from jax.experimental import pallas as pl
from jax.experimental.pallas import tpu as pltpu

EPS = 1e-16
_LANE = 128
_SUBLANE = 8   # f32 sublane count; W/H stay f32 so 8 (not 16) is the native pad


def _round_up(x: int, m: int) -> int:
    return ((x + m - 1) // m) * m


def _cdiv(a: int, b: int) -> int:
    return (a + b - 1) // b


def _pick_time_tile(S: int, C_pad: int, R_pad: int, halo: int, *,
                    ts_target: int = 16384,
                    vmem_budget: int = 12 * 1024 * 1024):
    """Pick a lane-aligned time tile TS (multiple of `halo`) and grid length.

    Sized so double-buffered H/out blocks + halo scratch + matmul temporaries
    stay within `vmem_budget` on every TPU generation, padding waste stays
    small (<= halo-1 lanes), and the grid has >= 2 steps whenever S allows it
    (so both v7x TensorCores get work; no-op on v5e/v6e).
    """
    S_al = _round_up(S, halo)
    # per-time-column VMEM bytes: H cur (2x buf) + out (2x buf) + halo scratch
    # + headroom for dot-result temporaries.
    bytes_per_col = 4 * (3 * R_pad + 3 * C_pad)
    ts_cap = min(ts_target, max(halo, vmem_budget // bytes_per_col))
    ts_cap = max(halo, (ts_cap // halo) * halo)
    n = _cdiv(S_al, ts_cap)
    if n == 1 and S_al >= 2 * halo:
        n = 2                      # give v7x's second TensorCore something to do
    if n > 1 and n % 2 == 1:
        n += 1                     # best effort: even number of steps for 2 TCs
    TS = _round_up(_cdiv(S_al, n), halo)
    n = _cdiv(S_al, TS)
    return TS, n


def seqnmf_forward(W: jax.Array, H: jax.Array, n_sample: int) -> jax.Array:
    """WxH = conv1d(H, W.flip(2), padding=T-1); shapes as in torch NMFD."""
    C, R, T = W.shape
    assert H.shape[0] == 1 and H.shape[1] == R
    L = H.shape[-1]
    S = L + T - 1
    assert S == n_sample, (S, n_sample)

    C_pad = _round_up(C, _SUBLANE)
    R_pad = _round_up(R, _SUBLANE)
    HALO = _round_up(max(T - 1, 1), _LANE)        # lane-aligned right halo width
    TS, n_tiles = _pick_time_tile(S, C_pad, R_pad, HALO)
    S_pad = n_tiles * TS
    S_halo = S_pad + HALO

    # ---- wrapper-side layout prep (plain JAX, tiny vs. the kernel traffic) ----
    # W laid out as (T, C_pad, R_pad): one small (C_pad, R_pad) matmul LHS per lag.
    Wt = jnp.transpose(W.astype(jnp.float32), (2, 0, 1))
    Wt = jnp.pad(Wt, ((0, 0), (0, C_pad - C), (0, R_pad - R)))

    # Hext[r, u] = H[r, u - (T-1)] (zero outside [0, L)).  The left pad folds in
    # the conv padding; the right pad supplies the (all-zero) halo after the
    # last tile, so the "next tile" index map never needs clamping.
    Hext = jnp.pad(H[0].astype(jnp.float32),
                   ((0, R_pad - R), (T - 1, S_halo - S)))

    def kernel(w_ref, hc_ref, hh_ref, o_ref, halo_ref):
        # w_ref   : (T, C_pad, R_pad)   f32, resident across the whole grid
        # hc_ref  : (R_pad, TS)         current time tile of Hext
        # hh_ref  : (R_pad, HALO)       first HALO columns of the next tile
        # o_ref   : (C_pad, TS)         f32 reconstruction tile
        # halo_ref: (R_pad, TS + HALO)  VMEM scratch: stitched [current | halo]
        # tau = T-1 needs no shift: its window is exactly the current tile.
        o_ref[...] = jnp.dot(w_ref[T - 1], hc_ref[...],
                             preferred_element_type=jnp.float32)
        if T > 1:
            halo_ref[:, :TS] = hc_ref[...]
            halo_ref[:, TS:] = hh_ref[...]
            for tau in range(T - 2, -1, -1):
                off = (T - 1) - tau            # static offset, < HALO
                o_ref[...] += jnp.dot(w_ref[tau],
                                      halo_ref[:, off:off + TS],
                                      preferred_element_type=jnp.float32)

    cost = pl.CostEstimate(
        flops=2 * C * R * T * S,
        transcendentals=0,
        bytes_accessed=4 * (R * L + C * R * T + C * S),
    )

    out = pl.pallas_call(
        kernel,
        out_shape=jax.ShapeDtypeStruct((C_pad, S_pad), jnp.float32),
        grid_spec=pltpu.PrefetchScalarGridSpec(
            num_scalar_prefetch=0,
            grid=(n_tiles,),
            in_specs=[
                pl.BlockSpec((T, C_pad, R_pad), lambda i: (0, 0, 0)),  # W resident
                pl.BlockSpec((R_pad, TS), lambda i: (0, i)),           # current tile
                pl.BlockSpec((R_pad, HALO),                            # next-tile halo
                             lambda i: (0, (i + 1) * (TS // HALO))),
            ],
            out_specs=pl.BlockSpec((C_pad, TS), lambda i: (0, i)),
            scratch_shapes=[pltpu.VMEM((R_pad, TS + HALO), jnp.float32)],
        ),
        compiler_params=pltpu.CompilerParams(
            dimension_semantics=("parallel",),   # v7x: 2 TCs split the time axis
            vmem_limit_bytes=32 * 1024 * 1024,
        ),
        cost_estimate=cost,
    )(Wt, Hext, Hext)

    # TODO(synk): for production this forward should be fused with the
    # multiplicative-update numerator/denominator matmuls (or batched over many
    # (W, H) problems) so the MXU sees M >= 128/256; at tiny shapes the call is
    # dominated by launch/DMA overhead.
    return out[:C, :S][None]    # (1, n_chan, n_sample), f32


def _reference_forward(W, H, n_sample):
    """Pure-JAX f32 reference identical to F.conv1d(H, W.flip(2), padding=T-1)."""
    C, R, T = W.shape
    L = H.shape[-1]
    S = L + T - 1
    out = jnp.zeros((C, S), jnp.float32)
    Wf = W.astype(jnp.float32)
    Hf = H[0].astype(jnp.float32)
    for tau in range(T):
        out = out.at[:, tau:tau + L].add(Wf[:, :, tau] @ Hf)
    return out[None]


def _init_params(key, n_chan, n_sample, n_convwin, rank):
    """Deterministic parameter init mirroring SeqNMF.__init__ (reinit_feats /
    reinit_coefs with feat_normalization='none'):
      H ~ |U(0,1)|, W ~ |U(0,1)| with W[:, motif_group0, :] = 1, then W += eps."""
    L = n_sample - n_convwin + 1
    kH, kW = jax.random.split(key)
    H = jax.random.uniform(kH, (1, rank, L), dtype=jnp.float32)
    W = jax.random.uniform(kW, (n_chan, rank, n_convwin), dtype=jnp.float32)
    W = W.at[:, 0, :].set(1.0)            # motif_groups[0] = [0]
    W = W + EPS                           # renorm_feats adds eps
    # TODO(synk): data-dependent host-side bookkeeping of __init__ (hashes via
    # time_ns, RunningShiftScaler state, numpy copies) has no Pallas equivalent
    # and does not affect forward(); it is omitted.
    return W, H


if __name__ == "__main__":
    key = jax.random.PRNGKey(0)
    # rank=11 is implied by the hard-coded motif_groups ([0], [1..5], [6..10]).
    # Second config uses a longer signal so the multi-tile grid + cross-tile
    # halo path is exercised.
    for n_chan, n_sample, n_convwin, rank in [(16, 128, 8, 11),
                                              (16, 400, 8, 11)]:
        kcase, key = jax.random.split(key)
        W, H = _init_params(kcase, n_chan, n_sample, n_convwin, rank)

        WxH = jax.block_until_ready(seqnmf_forward(W, H, n_sample))

        ref = _reference_forward(W, H, n_sample)
        assert WxH.shape == (1, n_chan, n_sample), WxH.shape
        np.testing.assert_allclose(np.asarray(WxH), np.asarray(ref),
                                   rtol=5e-3, atol=5e-3)

    print("KERNEL_OK")
</pallas_src>

<mosaic_0001>
module attributes {stable_mosaic.version = 11 : i64} {
  func.func @kernel(%arg0: i32, %arg1: memref<8x16x16xf32, #tpu.memory_space<vmem>>, %arg2: memref<16x128xf32, #tpu.memory_space<vmem>>, %arg3: memref<16x128xf32, #tpu.memory_space<vmem>>, %arg4: memref<16x128xf32, #tpu.memory_space<vmem>>, %arg5: memref<16x256xf32, #tpu.memory_space<vmem>>) attributes {dimension_semantics = [#tpu.dimension_semantics<parallel>], iteration_bounds = array<i64: 1>, scalar_prefetch = 0 : i64, scratch_operands = 1 : i64, tpu.core_type = #tpu.core_type<tc>, window_params = [{pipeline_mode = #tpu.pipeline_mode<synchronous>, transform_indices = @transform_0, window_bounds = array<i64: 8, 16, 16>}, {transform_indices = @transform_1, window_bounds = array<i64: 16, 128>}, {transform_indices = @transform_2, window_bounds = array<i64: 16, 128>}, {transform_indices = @transform_3, window_bounds = array<i64: 16, 128>}]} {
    %c7 = arith.constant 7 : index
    %c0 = arith.constant 0 : index
    %c0_0 = arith.constant 0 : index
    %0 = vector.load %arg1[%c7, %c0, %c0_0] : memref<8x16x16xf32, #tpu.memory_space<vmem>>, vector<1x16x16xf32>
    %1 = vector.shape_cast %0 : vector<1x16x16xf32> to vector<16x16xf32>
    %c0_1 = arith.constant 0 : index
    %c0_2 = arith.constant 0 : index
    %2 = vector.load %arg2[%c0_1, %c0_2] : memref<16x128xf32, #tpu.memory_space<vmem>>, vector<16x128xf32>
    %cst = arith.constant dense<0.000000e+00> : vector<16x128xf32>
    %3 = tpu.matmul %1, %2, %cst {dimension_numbers = #tpu.dot_dimension_numbers<[1], [0], [0], [1], [0, 0, 1, 1], [], []>} : vector<16x16xf32>, vector<16x128xf32>, vector<16x128xf32> -> vector<16x128xf32>
    %c0_3 = arith.constant 0 : index
    %c0_4 = arith.constant 0 : index
    %4 = vector.load %arg4[%c0_3, %c0_4] : memref<16x128xf32, #tpu.memory_space<vmem>>, vector<16x128xf32>
    tpu.vector_store %arg4[%c0_3, %c0_4], %3 {strides = array<i32>} : memref<16x128xf32, #tpu.memory_space<vmem>>, vector<16x128xf32>,
    %c0_5 = arith.constant 0 : index
    %c0_6 = arith.constant 0 : index
    %5 = vector.load %arg2[%c0_5, %c0_6] : memref<16x128xf32, #tpu.memory_space<vmem>>, vector<16x128xf32>
    %c0_7 = arith.constant 0 : index
    %c0_8 = arith.constant 0 : index
    %6 = vector.load %arg5[%c0_7, %c0_8] : memref<16x256xf32, #tpu.memory_space<vmem>>, vector<16x128xf32>
    tpu.vector_store %arg5[%c0_7, %c0_8], %5 {strides = array<i32>} : memref<16x256xf32, #tpu.memory_space<vmem>>, vector<16x128xf32>,
    %c0_9 = arith.constant 0 : index
    %c0_10 = arith.constant 0 : index
    %7 = vector.load %arg3[%c0_9, %c0_10] : memref<16x128xf32, #tpu.memory_space<vmem>>, vector<16x128xf32>
    %c0_11 = arith.constant 0 : index
    %c128 = arith.constant 128 : index
    %8 = vector.load %arg5[%c0_11, %c128] : memref<16x256xf32, #tpu.memory_space<vmem>>, vector<16x128xf32>
    tpu.vector_store %arg5[%c0_11, %c128], %7 {strides = array<i32>} : memref<16x256xf32, #tpu.memory_space<vmem>>, vector<16x128xf32>,
    %c0_12 = arith.constant 0 : index
    %c0_13 = arith.constant 0 : index
    %9 = vector.load %arg4[%c0_12, %c0_13] : memref<16x128xf32, #tpu.memory_space<vmem>>, vector<16x128xf32>
    %c6 = arith.constant 6 : index
    %c0_14 = arith.constant 0 : index
    %c0_15 = arith.constant 0 : index
    %10 = vector.load %arg1[%c6, %c0_14, %c0_15] : memref<8x16x16xf32, #tpu.memory_space<vmem>>, vector<1x16x16xf32>
    %11 = vector.shape_cast %10 : vector<1x16x16xf32> to vector<16x16xf32>
    %c0_16 = arith.constant 0 : index
    %c1 = arith.constant 1 : index
    %12 = vector.load %arg5[%c0_16, %c1] : memref<16x256xf32, #tpu.memory_space<vmem>>, vector<16x128xf32>
    %cst_17 = arith.constant dense<0.000000e+00> : vector<16x128xf32>
    %13 = tpu.matmul %11, %12, %cst_17 {dimension_numbers = #tpu.dot_dimension_numbers<[1], [0], [0], [1], [0, 0, 1, 1], [], []>} : vector<16x16xf32>, vector<16x128xf32>, vector<16x128xf32> -> vector<16x128xf32>
    %14 = arith.addf %9, %13 : vector<16x128xf32>
    %c0_18 = arith.constant 0 : index
    %c0_19 = arith.constant 0 : index
    %15 = vector.load %arg4[%c0_18, %c0_19] : memref<16x128xf32, #tpu.memory_space<vmem>>, vector<16x128xf32>
    tpu.vector_store %arg4[%c0_18, %c0_19], %14 {strides = array<i32>} : memref<16x128xf32, #tpu.memory_space<vmem>>, vector<16x128xf32>,
    %c0_20 = arith.constant 0 : index
    %c0_21 = arith.constant 0 : index
    %16 = vector.load %arg4[%c0_20, %c0_21] : memref<16x128xf32, #tpu.memory_space<vmem>>, vector<16x128xf32>
    %c5 = arith.constant 5 : index
    %c0_22 = arith.constant 0 : index
    %c0_23 = arith.constant 0 : index
    %17 = vector.load %arg1[%c5, %c0_22, %c0_23] : memref<8x16x16xf32, #tpu.memory_space<vmem>>, vector<1x16x16xf32>
    %18 = vector.shape_cast %17 : vector<1x16x16xf32> to vector<16x16xf32>
    %c0_24 = arith.constant 0 : index
    %c2 = arith.constant 2 : index
    %19 = vector.load %arg5[%c0_24, %c2] : memref<16x256xf32, #tpu.memory_space<vmem>>, vector<16x128xf32>
    %cst_25 = arith.constant dense<0.000000e+00> : vector<16x128xf32>
    %20 = tpu.matmul %18, %19, %cst_25 {dimension_numbers = #tpu.dot_dimension_numbers<[1], [0], [0], [1], [0, 0, 1, 1], [], []>} : vector<16x16xf32>, vector<16x128xf32>, vector<16x128xf32> -> vector<16x128xf32>
    %21 = arith.addf %16, %20 : vector<16x128xf32>
    %c0_26 = arith.constant 0 : index
    %c0_27 = arith.constant 0 : index
    %22 = vector.load %arg4[%c0_26, %c0_27] : memref<16x128xf32, #tpu.memory_space<vmem>>, vector<16x128xf32>
    tpu.vector_store %arg4[%c0_26, %c0_27], %21 {strides = array<i32>} : memref<16x128xf32, #tpu.memory_space<vmem>>, vector<16x128xf32>,
    %c0_28 = arith.constant 0 : index
    %c0_29 = arith.constant 0 : index
    %23 = vector.load %arg4[%c0_28, %c0_29] : memref<16x128xf32, #tpu.memory_space<vmem>>, vector<16x128xf32>
    %c4 = arith.constant 4 : index
    %c0_30 = arith.constant 0 : index
    %c0_31 = arith.constant 0 : index
    %24 = vector.load %arg1[%c4, %c0_30, %c0_31] : memref<8x16x16xf32, #tpu.memory_space<vmem>>, vector<1x16x16xf32>
    %25 = vector.shape_cast %24 : vector<1x16x16xf32> to vector<16x16xf32>
    %c0_32 = arith.constant 0 : index
    %c3 = arith.constant 3 : index
    %26 = vector.load %arg5[%c0_32, %c3] : memref<16x256xf32, #tpu.memory_space<vmem>>, vector<16x128xf32>
    %cst_33 = arith.constant dense<0.000000e+00> : vector<16x128xf32>
    %27 = tpu.matmul %25, %26, %cst_33 {dimension_numbers = #tpu.dot_dimension_numbers<[1], [0], [0], [1], [0, 0, 1, 1], [], []>} : vector<16x16xf32>, vector<16x128xf32>, vector<16x128xf32> -> vector<16x128xf32>
    %28 = arith.addf %23, %27 : vector<16x128xf32>
    %c0_34 = arith.constant 0 : index
    %c0_35 = arith.constant 0 : index
    %29 = vector.load %arg4[%c0_34, %c0_35] : memref<16x128xf32, #tpu.memory_space<vmem>>, vector<16x128xf32>
    tpu.vector_store %arg4[%c0_34, %c0_35], %28 {strides = array<i32>} : memref<16x128xf32, #tpu.memory_space<vmem>>, vector<16x128xf32>,
    %c0_36 = arith.constant 0 : index
    %c0_37 = arith.constant 0 : index
    %30 = vector.load %arg4[%c0_36, %c0_37] : memref<16x128xf32, #tpu.memory_space<vmem>>, vector<16x128xf32>
    %c3_38 = arith.constant 3 : index
    %c0_39 = arith.constant 0 : index
    %c0_40 = arith.constant 0 : index
    %31 = vector.load %arg1[%c3_38, %c0_39, %c0_40] : memref<8x16x16xf32, #tpu.memory_space<vmem>>, vector<1x16x16xf32>
    %32 = vector.shape_cast %31 : vector<1x16x16xf32> to vector<16x16xf32>
    %c0_41 = arith.constant 0 : index
    %c4_42 = arith.constant 4 : index
    %33 = vector.load %arg5[%c0_41, %c4_42] : memref<16x256xf32, #tpu.memory_space<vmem>>, vector<16x128xf32>
    %cst_43 = arith.constant dense<0.000000e+00> : vector<16x128xf32>
    %34 = tpu.matmul %32, %33, %cst_43 {dimension_numbers = #tpu.dot_dimension_numbers<[1], [0], [0], [1], [0, 0, 1, 1], [], []>} : vector<16x16xf32>, vector<16x128xf32>, vector<16x128xf32> -> vector<16x128xf32>
    %35 = arith.addf %30, %34 : vector<16x128xf32>
    %c0_44 = arith.constant 0 : index
    %c0_45 = arith.constant 0 : index
    %36 = vector.load %arg4[%c0_44, %c0_45] : memref<16x128xf32, #tpu.memory_space<vmem>>, vector<16x128xf32>
    tpu.vector_store %arg4[%c0_44, %c0_45], %35 {strides = array<i32>} : memref<16x128xf32, #tpu.memory_space<vmem>>, vector<16x128xf32>,
    %c0_46 = arith.constant 0 : index
    %c0_47 = arith.constant 0 : index
    %37 = vector.load %arg4[%c0_46, %c0_47] : memref<16x128xf32, #tpu.memory_space<vmem>>, vector<16x128xf32>
    %c2_48 = arith.constant 2 : index
    %c0_49 = arith.constant 0 : index
    %c0_50 = arith.constant 0 : index
    %38 = vector.load %arg1[%c2_48, %c0_49, %c0_50] : memref<8x16x16xf32, #tpu.memory_space<vmem>>, vector<1x16x16xf32>
    %39 = vector.shape_cast %38 : vector<1x16x16xf32> to vector<16x16xf32>
    %c0_51 = arith.constant 0 : index
    %c5_52 = arith.constant 5 : index
    %40 = vector.load %arg5[%c0_51, %c5_52] : memref<16x256xf32, #tpu.memory_space<vmem>>, vector<16x128xf32>
    %cst_53 = arith.constant dense<0.000000e+00> : vector<16x128xf32>
    %41 = tpu.matmul %39, %40, %cst_53 {dimension_numbers = #tpu.dot_dimension_numbers<[1], [0], [0], [1], [0, 0, 1, 1], [], []>} : vector<16x16xf32>, vector<16x128xf32>, vector<16x128xf32> -> vector<16x128xf32>
    %42 = arith.addf %37, %41 : vector<16x128xf32>
    %c0_54 = arith.constant 0 : index
    %c0_55 = arith.constant 0 : index
    %43 = vector.load %arg4[%c0_54, %c0_55] : memref<16x128xf32, #tpu.memory_space<vmem>>, vector<16x128xf32>
    tpu.vector_store %arg4[%c0_54, %c0_55], %42 {strides = array<i32>} : memref<16x128xf32, #tpu.memory_space<vmem>>, vector<16x128xf32>,
    %c0_56 = arith.constant 0 : index
    %c0_57 = arith.constant 0 : index
    %44 = vector.load %arg4[%c0_56, %c0_57] : memref<16x128xf32, #tpu.memory_space<vmem>>, vector<16x128xf32>
    %c1_58 = arith.constant 1 : index
    %c0_59 = arith.constant 0 : index
    %c0_60 = arith.constant 0 : index
    %45 = vector.load %arg1[%c1_58, %c0_59, %c0_60] : memref<8x16x16xf32, #tpu.memory_space<vmem>>, vector<1x16x16xf32>
    %46 = vector.shape_cast %45 : vector<1x16x16xf32> to vector<16x16xf32>
    %c0_61 = arith.constant 0 : index
    %c6_62 = arith.constant 6 : index
    %47 = vector.load %arg5[%c0_61, %c6_62] : memref<16x256xf32, #tpu.memory_space<vmem>>, vector<16x128xf32>
    %cst_63 = arith.constant dense<0.000000e+00> : vector<16x128xf32>
    %48 = tpu.matmul %46, %47, %cst_63 {dimension_numbers = #tpu.dot_dimension_numbers<[1], [0], [0], [1], [0, 0, 1, 1], [], []>} : vector<16x16xf32>, vector<16x128xf32>, vector<16x128xf32> -> vector<16x128xf32>
    %49 = arith.addf %44, %48 : vector<16x128xf32>
    %c0_64 = arith.constant 0 : index
    %c0_65 = arith.constant 0 : index
    %50 = vector.load %arg4[%c0_64, %c0_65] : memref<16x128xf32, #tpu.memory_space<vmem>>, vector<16x128xf32>
    tpu.vector_store %arg4[%c0_64, %c0_65], %49 {strides = array<i32>} : memref<16x128xf32, #tpu.memory_space<vmem>>, vector<16x128xf32>,
    %c0_66 = arith.constant 0 : index
    %c0_67 = arith.constant 0 : index
    %51 = vector.load %arg4[%c0_66, %c0_67] : memref<16x128xf32, #tpu.memory_space<vmem>>, vector<16x128xf32>
    %c0_68 = arith.constant 0 : index
    %c0_69 = arith.constant 0 : index
    %c0_70 = arith.constant 0 : index
    %52 = vector.load %arg1[%c0_68, %c0_69, %c0_70] : memref<8x16x16xf32, #tpu.memory_space<vmem>>, vector<1x16x16xf32>
    %53 = vector.shape_cast %52 : vector<1x16x16xf32> to vector<16x16xf32>
    %c0_71 = arith.constant 0 : index
    %c7_72 = arith.constant 7 : index
    %54 = vector.load %arg5[%c0_71, %c7_72] : memref<16x256xf32, #tpu.memory_space<vmem>>, vector<16x128xf32>
    %cst_73 = arith.constant dense<0.000000e+00> : vector<16x128xf32>
    %55 = tpu.matmul %53, %54, %cst_73 {dimension_numbers = #tpu.dot_dimension_numbers<[1], [0], [0], [1], [0, 0, 1, 1], [], []>} : vector<16x16xf32>, vector<16x128xf32>, vector<16x128xf32> -> vector<16x128xf32>
    %56 = arith.addf %51, %55 : vector<16x128xf32>
    %c0_74 = arith.constant 0 : index
    %c0_75 = arith.constant 0 : index
    %57 = vector.load %arg4[%c0_74, %c0_75] : memref<16x128xf32, #tpu.memory_space<vmem>>, vector<16x128xf32>
    tpu.vector_store %arg4[%c0_74, %c0_75], %56 {strides = array<i32>} : memref<16x128xf32, #tpu.memory_space<vmem>>, vector<16x128xf32>,
    return
  }
  func.func @transform_0(%arg0: i32) -> (i32, i32, i32) {
    %c0_i32 = arith.constant 0 : i32
    %c0_i32_0 = arith.constant 0 : i32
    %c0_i32_1 = arith.constant 0 : i32
    %c0_i32_2 = arith.constant 0 : i32
    return %c0_i32, %c0_i32_0, %c0_i32_1 : i32, i32, i32
  }
  func.func @transform_1(%arg0: i32) -> (i32, i32) {
    %c0_i32 = arith.constant 0 : i32
    %c0_i32_0 = arith.constant 0 : i32
    return %c0_i32, %arg0 : i32, i32
  }
  func.func @transform_2(%arg0: i32) -> (i32, i32) {
    %c1_i32 = arith.constant 1 : i32
    %0 = arith.addi %arg0, %c1_i32 : i32
    %c1_i32_0 = arith.constant 1 : i32
    %1 = arith.muli %0, %c1_i32_0 : i32
    %c0_i32 = arith.constant 0 : i32
    %c0_i32_1 = arith.constant 0 : i32
    return %c0_i32, %1 : i32, i32
  }
  func.func @transform_3(%arg0: i32) -> (i32, i32) {
    %c0_i32 = arith.constant 0 : i32
    %c0_i32_0 = arith.constant 0 : i32
    return %c0_i32, %arg0 : i32, i32
  }
}

</mosaic_0001>

<bundles_post_ra>
// kernel: tpu_custom_call.1
= control target key start
LH: loop header
LB: loop body
LE: loop exit
PB: predicated region body
PF: predicated region fallthrough
CT: control target
= control target key end

     0   :  { %8 = vsyncpa [#allocation4], 0  ;;  %s824_s0 = inlined_call_operand.hbm [shape: f32[8,16,16], index: 0, kind: input, shape index: {}]   ;;  %s825_s1 = inlined_call_operand.hbm [shape: f32[16,256], index: 1, kind: input, shape index: {}]   ;;  %s826_s2 = inlined_call_operand.hbm [shape: f32[16,256], index: 2, kind: input, shape index: {}]   ;;  %s827_s3 = inlined_call_operand.hbm [shape: f32[16,128], index: 3, kind: output, shape index: {}]  }
   0x1   :  { %9 = vsyncpa [#allocation7], 0 }
   0x2   :  { %10 = vsyncpa [#allocation5], 0  ;;  %s28_s14 = sshll.u32 %s825_s1, 4  ;;  %s746_s15 = smov [#allocation6]   ;;  %s29_s14 = int_to_ptr.hbm [resolvable:$true] %s28_s14 }
   0x3   :  { %s30_s16 = sshll.u32 %s746_s15, 4  ;;  %s747_s17 = smov 256   ;;  %s31_s16 = int_to_ptr.vmem [resolvable:$true] %s30_s16 }
   0x4   :  { %s748_s18 = smov 128   ;;  %s749_s19 = smov 8  }
   0x5   :  { %36 = dma.hbm_to_vmem [thread:$0]  %s29_s14, 256, %s31_s16, [#allocation7], %s747_s17, %s748_s18, %s749_s19  }
   0x6   :  { %s15_s22 = sshll.u32 %s824_s0, 4  ;;  %s750_s23 = smov [#allocation3]   ;;  %s16_s22 = int_to_ptr.hbm [resolvable:$true] %s15_s22 }
   0x7   :  { %s17_s24 = sshll.u32 %s750_s23, 4  ;;  %s543_s26 = scalar_lea.hbm %s826_s2, 8  ;;  %s18_s24 = int_to_ptr.vmem [resolvable:$true] %s17_s24 }
   0x8   :  { %23 = dma.hbm_to_vmem [thread:$0]  %s16_s22, 2048, %s18_s24, [#allocation4], %s748_s18, %s748_s18, %s749_s19  }
   0x9   :  { %s44_s27 = sshll.u32 %s543_s26, 4  ;;  %s751_s28 = smov [#allocation8]   ;;  %s45_s27 = int_to_ptr.hbm [resolvable:$true] %s44_s27 }
   0xa   :  { %s46_s29 = sshll.u32 %s751_s28, 4  ;;  %s47_s29 = int_to_ptr.vmem [resolvable:$true] %s46_s29 }
   0xb   :  { %52 = dma.hbm_to_vmem [thread:$0]  %s45_s27, 256, %s47_s29, [#allocation7], %s747_s17, %s748_s18, %s749_s19  }
   0xc   :  { %740 = dma.done.wait [#allocation4], 2048  }
   0xd   :  { %741 = vsyncadd [#allocation4], 4294965248 }
   0xe   :  { %742 = dma.done.wait [#allocation7], 512  }
   0xf   :  { %743 = vsyncadd [#allocation7], 4294966784  ;;  %v104_v0 = vld [vmem:[#allocation6 + $0x8] sm:$0xff]  ;;  %v108_v1 = vld [vmem:[#allocation8 + $0x8] sm:$0xff]  ;;  %s752_s0 = smov 127   ;;  %s753_s2 = smov 126  }
  0x10   :  { %v574_v2 = vpack.i.bf16 %v108_v1, %v104_v0  ;;  %92 = vmatpush.msra.mxu0 %v104_v0  ;;  %v103_v3 = vld [vmem:[#allocation6] sm:$0xff]  ;;  %v107_v4 = vld [vmem:[#allocation8] sm:$0xff]  ;;  %s754_s30 = smov 125   ;;  %s755_s4 = smov 124   ;;  %vm71_vm0 = vcmask 130048   ;;  %vm250_vm1 = vcmask 1022976  }
  0x11   :  { %v579_v5 = vpack.i.bf16 %v107_v4, %v103_v3  ;;  %s756_s5 = smov 123   ;;  %s757_s6 = smov 122   ;;  %v67_v6 = vld [vmem:[#allocation3 + $0x70] sm:$0xff]  ;;  %v68_v10 = vld [vmem:[#allocation3 + $0x78] sm:$0xff]  ;;  %v232_v16 = vld [vmem:[#allocation3 + $0x40] sm:$0xff]  ;;  %vm132_vm2 = vcmask 1039360  }
  0x12   :  { %575 = vrot.lane.b32.xlu0 %v574_v2, %s752_s0  ;;  %585 = vrot.lane.b32.xlu1 %v574_v2, %s753_s2  ;;  %s758_s7 = smov 121   ;;  %v233_v17 = vld [vmem:[#allocation3 + $0x48] sm:$0xff]  ;;  %vm191_vm3 = vcmask 1031168   ;;  %vm368_vm4 = vcmask 1006592   ;;  %v114_v35 = vld [vmem:[#allocation3 + $0x60] sm:$0xff]  ;;  %v173_v36 = vld [vmem:[#allocation3 + $0x50] sm:$0xff] }
  0x13   :  { %595 = vrot.lane.b32.xlu2 %v574_v2, %s754_s30  ;;  %93 = vmatpush.msra.mxu0 %v103_v3  ;;  %vm309_vm5 = vcmask 1014784   ;;  %v115_v46 = vld [vmem:[#allocation3 + $0x68] sm:$0xff]  ;;  %v174_v47 = vld [vmem:[#allocation3 + $0x58] sm:$0xff]  ;;  %v291_v50 = vld [vmem:[#allocation3 + $0x30] sm:$0xff]  ;;  %vm427_vm6 = vcmask 998400   ;;  %vm485_vm7 = vcmask 990208  }
  0x14   :  { %544 = vmatmul.msk.f32.vlgmr.msra.gmra.mxu0 %vm71_vm0, %v67_v6  ;;  %v350_v60 = vld [vmem:[#allocation3 + $0x20] sm:$0xff]  ;;  %v292_v0 = vld [vmem:[#allocation3 + $0x38] sm:$0xff]  ;;  %v409_v1 = vld [vmem:[#allocation3 + $0x10] sm:$0xff]  ;;  %s759_s8 = smov [#allocation9]   ;;  %s529_s12 = sshll.u32 %s827_s3, 4  ;;  %s530_s12 = int_to_ptr.hbm [resolvable:$true] %s529_s12 }
  0x15   :  { %s527_s9 = sshll.u32 %s759_s8, 4  ;;  %s528_s9 = int_to_ptr.vmem [resolvable:$true] %s527_s9 }
  0x1a   :  { %580 = vrot.lane.b32.xlu0 %v579_v5, %s752_s0  ;;  %590 = vrot.lane.b32.xlu1 %v579_v5, %s753_s2 }
  0x1b   :  { %600 = vrot.lane.b32.xlu2 %v579_v5, %s754_s30 }
  0x1c   :  { %545 = vmatmul.msk.f32.gmra.mxu0 %vm71_vm0, %v68_v10 }
  0x22   :  { %605 = vrot.lane.b32.xlu0 %v574_v2, %s755_s4  ;;  %610 = vrot.lane.b32.xlu1 %v579_v5, %s755_s4 }
  0x23   :  { %615 = vrot.lane.b32.xlu2 %v574_v2, %s756_s5 }
  0x2a   :  { %625 = vrot.lane.b32.xlu1 %v574_v2, %s757_s6  ;;  %620 = vrot.lane.b32.xlu0 %v579_v5, %s756_s5 }
  0x2b   :  { %630 = vrot.lane.b32.xlu2 %v579_v5, %s757_s6 }
  0x32   :  { %635 = vrot.lane.b32.xlu0 %v574_v2, %s758_s7  ;;  %640 = vrot.lane.b32.xlu1 %v579_v5, %s758_s7 }
  0x6d   :  { %v596_v7 = vpop.permute.xlu2 %595 }
  0x6e   :  { %v598_v8 = vunpack.i.h.bf16 %v596_v7  ;;  %v597_v9 = vunpack.i.l.bf16 %v596_v7 }
  0x70   :  { %v252_v11 = vsel %vm250_vm1, %v597_v9, %v598_v8  ;;  %v351_v8 = vld [vmem:[#allocation3 + $0x28] sm:$0xff] }
  0x71   :  { %275 = vmatpush.msra.mxu3 %v252_v11  ;;  %v410_v11 = vld [vmem:[#allocation3 + $0x18] sm:$0xff] }
  0x75   :  { %v601_v12 = vpop.permute.xlu2 %600 }
  0x76   :  { %v603_v13 = vunpack.i.h.bf16 %v601_v12  ;;  %v602_v14 = vunpack.i.l.bf16 %v601_v12  ;;  %v467_v12 = vld [vmem:[#allocation3] sm:$0xff] }
  0x78   :  { %v251_v15 = vsel %vm250_vm1, %v602_v14, %v603_v13  ;;  %v468_v13 = vld [vmem:[#allocation3 + $0x8] sm:$0xff] }
  0x79   :  { %276 = vmatpush.msra.mxu3 %v251_v15 }
  0x7a   :  { %550 = vmatmul.msk.f32.vlgmr.msra.gmra.mxu3 %vm71_vm0, %v232_v16 }
  0x7d   :  { %v616_v26 = vpop.permute.xlu2 %615 }
  0x7e   :  { %v618_v27 = vunpack.i.h.bf16 %v616_v26  ;;  %v617_v28 = vunpack.i.l.bf16 %v616_v26 }
  0x80   :  { %v370_v39 = vsel %vm368_vm4, %v617_v28, %v618_v27 }
  0x82   :  { %551 = vmatmul.msk.f32.gmra.mxu3 %vm71_vm0, %v233_v17 }
  0x84   :  { %v576_v18 = vpop.permute.xlu0 %575  ;;  %v586_v19 = vpop.permute.xlu1 %585 }
  0x85   :  { %v578_v20 = vunpack.i.h.bf16 %v576_v18  ;;  %v577_v21 = vunpack.i.l.bf16 %v576_v18  ;;  %v588_v22 = vunpack.i.h.bf16 %v586_v19  ;;  %v587_v23 = vunpack.i.l.bf16 %v586_v19  ;;  %v631_v51 = vpop.permute.xlu2 %630 }
  0x86   :  { %v633_v52 = vunpack.i.h.bf16 %v631_v51  ;;  %v632_v53 = vunpack.i.l.bf16 %v631_v51 }
  0x87   :  { %v134_v24 = vsel %vm132_vm2, %v577_v21, %v578_v20  ;;  %v193_v25 = vsel %vm191_vm3, %v587_v23, %v588_v22 }
  0x88   :  { %157 = vmatpush.msra.mxu1 %v134_v24  ;;  %216 = vmatpush.msra.mxu2 %v193_v25  ;;  %v428_v63 = vsel %vm427_vm6, %v632_v53, %v633_v52 }
  0x8c   :  { %v581_v29 = vpop.permute.xlu0 %580  ;;  %v591_v30 = vpop.permute.xlu1 %590 }
  0x8d   :  { %v583_v31 = vunpack.i.h.bf16 %v581_v29  ;;  %v582_v32 = vunpack.i.l.bf16 %v581_v29  ;;  %v593_v33 = vunpack.i.h.bf16 %v591_v30  ;;  %v592_v34 = vunpack.i.l.bf16 %v591_v30 }
  0x8f   :  { %v133_v37 = vsel %vm132_vm2, %v582_v32, %v583_v31  ;;  %v192_v38 = vsel %vm191_vm3, %v592_v34, %v593_v33 }
  0x90   :  { %158 = vmatpush.msra.mxu1 %v133_v37  ;;  %217 = vmatpush.msra.mxu2 %v192_v38 }
  0x91   :  { %546 = vmatmul.msk.f32.vlgmr.msra.gmra.mxu1 %vm71_vm0, %v114_v35  ;;  %548 = vmatmul.msk.f32.vlgmr.msra.gmra.mxu2 %vm71_vm0, %v173_v36  ;;  %v95_v14 = vpop.f32.mrf.mxu0 }
  0x92   :  { %393 = vmatpush.msrb.mxu1 %v370_v39 }
  0x94   :  { %v606_v40 = vpop.permute.xlu0 %605  ;;  %v611_v41 = vpop.permute.xlu1 %610 }
  0x95   :  { %v608_v42 = vunpack.i.h.bf16 %v606_v40  ;;  %v607_v43 = vunpack.i.l.bf16 %v606_v40  ;;  %v613_v44 = vunpack.i.h.bf16 %v611_v41  ;;  %v612_v45 = vunpack.i.l.bf16 %v611_v41 }
  0x97   :  { %v311_v48 = vsel %vm309_vm5, %v607_v43, %v608_v42  ;;  %v310_v49 = vsel %vm309_vm5, %v612_v45, %v613_v44 }
  0x98   :  { %334 = vmatpush.msrb.mxu0 %v311_v48 }
  0x99   :  { %547 = vmatmul.msk.f32.gmra.mxu1 %vm71_vm0, %v115_v46  ;;  %549 = vmatmul.msk.f32.gmra.mxu2 %vm71_vm0, %v174_v47  ;;  %v98_v17 = vpop.f32.mrf.mxu0 }
  0x9a   :  { %335 = vmatpush.msrb.mxu0 %v310_v49 }
  0x9b   :  { %552 = vmatmul.msk.f32.vlgmr.msrb.gmra.mxu0 %vm71_vm0, %v291_v50 }
  0x9c   :  { %v626_v54 = vpop.permute.xlu1 %625  ;;  %v621_v55 = vpop.permute.xlu0 %620 }
  0x9d   :  { %v628_v56 = vunpack.i.h.bf16 %v626_v54  ;;  %v627_v57 = vunpack.i.l.bf16 %v626_v54  ;;  %v623_v58 = vunpack.i.h.bf16 %v621_v55  ;;  %v622_v59 = vunpack.i.l.bf16 %v621_v55 }
  0x9f   :  { %v429_v61 = vsel %vm427_vm6, %v627_v57, %v628_v56  ;;  %v369_v62 = vsel %vm368_vm4, %v622_v59, %v623_v58 }
  0xa0   :  { %452 = vmatpush.msrb.mxu2 %v429_v61  ;;  %394 = vmatpush.msrb.mxu1 %v369_v62 }
  0xa1   :  { %554 = vmatmul.msk.f32.vlgmr.msrb.gmra.mxu1 %vm71_vm0, %v350_v60 }
  0xa2   :  { %453 = vmatpush.msrb.mxu2 %v428_v63 }
  0xa3   :  { %553 = vmatmul.msk.f32.gmra.mxu0 %vm71_vm0, %v292_v0  ;;  %556 = vmatmul.msk.f32.vlgmr.msrb.gmra.mxu2 %vm71_vm0, %v409_v1 }
  0xa4   :  { %v636_v2 = vpop.permute.xlu0 %635  ;;  %v641_v3 = vpop.permute.xlu1 %640 }
  0xa5   :  { %v638_v4 = vunpack.i.h.bf16 %v636_v2  ;;  %v637_v5 = vunpack.i.l.bf16 %v636_v2  ;;  %v643_v6 = vunpack.i.h.bf16 %v641_v3  ;;  %v642_v7 = vunpack.i.l.bf16 %v641_v3 }
  0xa7   :  { %v487_v9 = vsel %vm485_vm7, %v637_v5, %v638_v4  ;;  %v486_v10 = vsel %vm485_vm7, %v642_v7, %v643_v6 }
  0xa8   :  { %510 = vmatpush.msrb.mxu3 %v487_v9 }
  0xa9   :  { %555 = vmatmul.msk.f32.gmra.mxu1 %vm71_vm0, %v351_v8 }
  0xaa   :  { %511 = vmatpush.msrb.mxu3 %v486_v10 }
  0xab   :  { %557 = vmatmul.msk.f32.gmra.mxu2 %vm71_vm0, %v410_v11  ;;  %558 = vmatmul.msk.f32.vlgmr.msrb.gmra.mxu3 %vm71_vm0, %v467_v12 }
  0xb3   :  { %559 = vmatmul.msk.f32.gmra.mxu3 %vm71_vm0, %v468_v13 }
  0xfd   :  { %v278_v20 = vpop.f32.mrf.mxu3 }
 0x105   :  { %v281_v26 = vpop.f32.mrf.mxu3 }
 0x10e   :  { %v160_v15 = vpop.f32.mrf.mxu1 }
 0x10f   :  { %v166_v18 = vadd.f32 %v160_v15, %v95_v14 }
 0x114   :  { %v219_v16 = vpop.f32.mrf.mxu2 }
 0x115   :  { %v225_v22 = vadd.f32 %v219_v16, %v166_v18 }
 0x116   :  { %v163_v19 = vpop.f32.mrf.mxu1 }
 0x117   :  { %v167_v24 = vadd.f32 %v163_v19, %v98_v17  ;;  %v284_v25 = vadd.f32 %v278_v20, %v225_v22 }
 0x118   :  { %v337_v23 = vpop.f32.mrf.mxu0 }
 0x119   :  { %v343_v29 = vadd.f32 %v337_v23, %v284_v25 }
 0x11c   :  { %v222_v21 = vpop.f32.mrf.mxu2 }
 0x11d   :  { %v226_v28 = vadd.f32 %v222_v21, %v167_v24 }
 0x11e   :  { %v396_v27 = vpop.f32.mrf.mxu1 }
 0x11f   :  { %v285_v31 = vadd.f32 %v281_v26, %v226_v28  ;;  %v402_v32 = vadd.f32 %v396_v27, %v343_v29 }
 0x120   :  { %v340_v33 = vpop.f32.mrf.mxu0 }
 0x121   :  { %v344_v36 = vadd.f32 %v340_v33, %v285_v31 }
 0x126   :  { %v455_v30 = vpop.f32.mrf.mxu2  ;;  %v399_v38 = vpop.f32.mrf.mxu1 }
 0x127   :  { %v461_v34 = vadd.f32 %v455_v30, %v402_v32  ;;  %v403_v40 = vadd.f32 %v399_v38, %v344_v36 }
 0x12e   :  { %v513_v35 = vpop.f32.mrf.mxu3  ;;  %v458_v39 = vpop.f32.mrf.mxu2 }
 0x12f   :  { %v519_v37 = vadd.f32 %v513_v35, %v461_v34  ;;  %v462_v41 = vadd.f32 %v458_v39, %v403_v40 }
 0x131   :  { %521 = vst [vmem:[#allocation9] sm:$0xff] %v519_v37 }
 0x136   :  { %v516_v42 = vpop.f32.mrf.mxu3 }
 0x137   :  { %v520_v43 = vadd.f32 %v516_v42, %v462_v41 }
 0x139   :  { %522 = vst [vmem:[#allocation9 + $0x8] sm:$0xff] %v520_v43 }
 0x13a   :  { %535 = dma.vmem_to_hbm [thread:$0]  %s528_s9, 256, %s530_s12, [#allocation5], %s748_s18, %s748_s18, %s749_s19  }
 0x13b   :  { %744 = dma.done.wait [#allocation5], 256  }
 0x13c   :  { %745 = vsyncadd [#allocation5], 4294967040 }
 0x13d   :  { %540 = vsyncpa [#allocation4], 1 }
 0x13e   :  { %541 = vsyncpa [#allocation7], 1 }
 0x13f   :  { %542 = vsyncpa [#allocation5], 1 }

</bundles_post_ra>
